<compile_context>
chip_gen: v7x
topology: tpu7x:2x2x1
jax: 0.10.0
libtpu: 0.0.40
codegen_flags: <defaults>
</compile_context>

<pallas_src>
import functools
import math

import jax
import jax.numpy as jnp
from jax import lax
from jax.experimental import pallas as pl
from jax.experimental.pallas import tpu as pltpu


def _py2_round(x):
    return math.floor(x + 0.5) if x >= 0.0 else math.ceil(x - 0.5)


def _get_divisible_by(num, divisible_by, min_val):
    ret = int(num)
    if divisible_by > 0 and num % divisible_by != 0:
        ret = int((_py2_round(num / divisible_by) or min_val) * divisible_by)
    return ret


def _irf_kernel(x_ref, wpw_ref, bpw_ref, wdw_ref, bdw_ref, mask_ref,
                wpwl_ref, bpwl_ref, o_ref,
                *, Cin, Cmid, Cout, K, W, HW, pad, use_res):
    x = x_ref[0]                                   # (Cin, HW)  lane-dense

    # ---- pw: 1x1 conv + folded BN + ReLU.
    # Tiny contraction (Cin) -> unrolled VPU broadcast-MACs; MXU stays free.
    wpw_t = wpw_ref[...]                           # (Cmid, Cin), BN scale folded
    y = bpw_ref[...]                               # (Cmid, 1) bias, broadcasts
    if Cin <= 16:
        for c in range(Cin):
            y = y + wpw_t[:, c:c + 1] * x[c:c + 1, :]
    else:
        y = y + jnp.dot(wpw_t, x, preferred_element_type=jnp.float32)
    y = jnp.maximum(y, 0.0)                        # (Cmid, HW)

    # ---- dw: depthwise KxK conv (stride=1, pad=K//2) + folded BN + ReLU.
    # No padded scratch: each tap is a lane roll (XLU) of the flattened (C, HW)
    # activation, masked at the image borders, scaled by the per-channel tap
    # weight (BN scale folded in) and accumulated on the VPU.
    wdw_t = wdw_ref[...]                           # (Cmid, K*K)
    masks = mask_ref[...]                          # (K*K, HW) 0/1 border masks
    acc = bdw_ref[...]                             # (Cmid, 1) bias folded into init
    for ki in range(K):
        for kj in range(K):
            k = ki * K + kj
            d = (ki - pad) * W + (kj - pad)        # flattened spatial offset
            shifted = y if d == 0 else pltpu.roll(y, (-d) % HW, 1)
            acc = acc + shifted * (wdw_t[:, k:k + 1] * masks[k:k + 1, :])
    y = jnp.maximum(acc, 0.0)                      # (Cmid, HW)

    # ---- pwl: 1x1 conv + folded BN + ReLU (contraction Cmid -> MXU matmul).
    z = jnp.dot(wpwl_ref[...], y, preferred_element_type=jnp.float32)  # (Cout, HW)
    z = jnp.maximum(z + bpwl_ref[...], 0.0)

    if use_res:                                    # stride==1 and Cin==Cout
        z = z + x

    o_ref[0] = z                                   # lane-dense (Cout, HW) store


def irf_block_pallas(x_nchw, params, *, stride, kernel, use_res):
    wpw, spw, bpw, wdw, sdw, bdw, wpwl, spwl, bpwl = params
    assert stride == 1, "TODO(synk): stride > 1 not implemented in this kernel"
    N, Cin, H, W = x_nchw.shape
    Cmid = wpw.shape[1]
    Cout = wpwl.shape[1]
    K = kernel
    pad = K // 2
    HW = H * W

    # Fold BN scales into conv weights (linear, identical numerics); keep biases.
    wpw_t = (wpw * spw).T.astype(jnp.float32)          # (Cmid, Cin)
    bpw_c = bpw.reshape(Cmid, 1).astype(jnp.float32)
    wdw_t = (wdw * sdw).T.astype(jnp.float32)          # (Cmid, K*K)
    bdw_c = bdw.reshape(Cmid, 1).astype(jnp.float32)
    wpwl_t = (wpwl * spwl).T.astype(jnp.float32)       # (Cout, Cmid)
    bpwl_c = bpwl.reshape(Cout, 1).astype(jnp.float32)

    # Per-tap validity masks implementing the zero padding of the dw conv.
    hh = jnp.arange(H).reshape(H, 1)
    ww = jnp.arange(W).reshape(1, W)
    mrows = []
    for ki in range(K):
        for kj in range(K):
            dh, dw_ = ki - pad, kj - pad
            m = ((hh + dh >= 0) & (hh + dh < H) & (ww + dw_ >= 0) & (ww + dw_ < W))
            mrows.append(m.reshape(1, HW))
    masks = jnp.concatenate(mrows, axis=0).astype(jnp.float32)   # (K*K, HW)

    # Pure reshape (no transpose): channel-major, spatial flattened onto lanes.
    x = x_nchw.reshape(N, Cin, HW).astype(jnp.float32)

    kern = functools.partial(_irf_kernel, Cin=Cin, Cmid=Cmid, Cout=Cout,
                             K=K, W=W, HW=HW, pad=pad, use_res=use_res)

    def full(a):
        s = a.shape
        return pl.BlockSpec(s, lambda n, _nd=len(s): (0,) * _nd)

    weight_bytes = sum(int(a.size) * 4 for a in
                       (wpw_t, bpw_c, wdw_t, bdw_c, masks, wpwl_t, bpwl_c))
    cost = pl.CostEstimate(
        flops=int(N * (2 * HW * Cin * Cmid
                       + 2 * HW * K * K * Cmid
                       + 2 * HW * Cmid * Cout)),
        transcendentals=0,
        bytes_accessed=int(N * Cin * HW * 4 + N * Cout * HW * 4 + weight_bytes),
    )

    out = pl.pallas_call(
        kern,
        out_shape=jax.ShapeDtypeStruct((N, Cout, HW), jnp.float32),
        grid=(N,),
        in_specs=[
            pl.BlockSpec((1, Cin, HW), lambda n: (n, 0, 0)),
            full(wpw_t), full(bpw_c),
            full(wdw_t), full(bdw_c), full(masks),
            full(wpwl_t), full(bpwl_c),
        ],
        out_specs=pl.BlockSpec((1, Cout, HW), lambda n: (n, 0, 0)),
        compiler_params=pltpu.CompilerParams(dimension_semantics=("parallel",)),
        cost_estimate=cost,
    )(x, wpw_t, bpw_c, wdw_t, bdw_c, masks, wpwl_t, bpwl_c)

    return out.reshape(N, Cout, H, W)              # pure reshape, no transpose


def make_params(key, Cin, Cout, expansion, kernel, width_divisor=1):
    Cmid = _get_divisible_by(int(Cin * expansion), width_divisor, width_divisor)
    K = kernel
    ks = jax.random.split(key, 16)
    eps = 1e-5

    def bn_fold(k0, k1, k2, k3, C):
        gamma = 1.0 + 0.1 * jax.random.normal(k0, (C,), jnp.float32)
        beta = 0.1 * jax.random.normal(k1, (C,), jnp.float32)
        mean = 0.1 * jax.random.normal(k2, (C,), jnp.float32)
        var = jnp.abs(1.0 + 0.1 * jax.random.normal(k3, (C,), jnp.float32))
        scale = gamma / jnp.sqrt(var + eps)
        bias = beta - mean * scale
        return scale.reshape(1, C), bias.reshape(1, C)

    wpw = 0.2 * jax.random.normal(ks[0], (Cin, Cmid), jnp.float32)       # (Cin, Cmid)
    spw, bpw = bn_fold(ks[1], ks[2], ks[3], ks[4], Cmid)
    wdw = 0.2 * jax.random.normal(ks[5], (K * K, Cmid), jnp.float32)     # tap-major
    sdw, bdw = bn_fold(ks[6], ks[7], ks[8], ks[9], Cmid)
    wpwl = 0.2 * jax.random.normal(ks[10], (Cmid, Cout), jnp.float32)    # (Cmid, Cout)
    spwl, bpwl = bn_fold(ks[11], ks[12], ks[13], ks[14], Cout)
    return (wpw, spw, bpw, wdw, sdw, bdw, wpwl, spwl, bpwl)


def irf_ref(x_nchw, params, *, stride, kernel, use_res):
    """Pure-JAX reference (XLA convs) for correctness checking."""
    wpw, spw, bpw, wdw, sdw, bdw, wpwl, spwl, bpwl = params
    K = kernel
    pad = K // 2
    Cin, Cmid = wpw.shape
    Cout = wpwl.shape[1]
    dn = ('NHWC', 'HWIO', 'NHWC')
    x = jnp.transpose(x_nchw, (0, 2, 3, 1)).astype(jnp.float32)
    y = lax.conv_general_dilated(x, wpw.reshape(1, 1, Cin, Cmid), (1, 1), 'VALID',
                                 dimension_numbers=dn)
    y = jnp.maximum(y * spw.reshape(Cmid) + bpw.reshape(Cmid), 0.0)
    y = lax.conv_general_dilated(y, wdw.reshape(K, K, 1, Cmid), (stride, stride),
                                 [(pad, pad), (pad, pad)], dimension_numbers=dn,
                                 feature_group_count=Cmid)
    y = jnp.maximum(y * sdw.reshape(Cmid) + bdw.reshape(Cmid), 0.0)
    y = lax.conv_general_dilated(y, wpwl.reshape(1, 1, Cmid, Cout), (1, 1), 'VALID',
                                 dimension_numbers=dn)
    y = jnp.maximum(y * spwl.reshape(Cout) + bpwl.reshape(Cout), 0.0)
    if use_res:
        y = y + x
    return jnp.transpose(y, (0, 3, 1, 2))


if __name__ == "__main__":
    key = jax.random.PRNGKey(0)
    kx, kp = jax.random.split(key)

    # IRFBlock(input_depth=4, output_depth=4, expansion=6, stride=1, kernel=3)
    N, Cin, H, W = 2, 4, 16, 16
    Cout, expansion, stride, kernel = 4, 6, 1, 3
    use_res = (stride == 1 and Cin == Cout)

    x = jax.random.normal(kx, (N, Cin, H, W), jnp.float32)
    params = make_params(kp, Cin, Cout, expansion, kernel)

    out = irf_block_pallas(x, params, stride=stride, kernel=kernel, use_res=use_res)
    out = jax.block_until_ready(out)

    ref = irf_ref(x, params, stride=stride, kernel=kernel, use_res=use_res)
    assert out.shape == ref.shape, (out.shape, ref.shape)
    err = float(jnp.max(jnp.abs(out - ref)))
    assert jnp.allclose(out, ref, atol=1e-4, rtol=1e-4), f"max abs err {err}"
    print("KERNEL_OK")
</pallas_src>

<mosaic_0001>
module attributes {stable_mosaic.version = 11 : i64} {
  func.func @_irf_kernel(%arg0: i32, %arg1: memref<1x4x256xf32, #tpu.memory_space<vmem>>, %arg2: memref<24x4xf32, #tpu.memory_space<vmem>>, %arg3: memref<24x1xf32, #tpu.memory_space<vmem>>, %arg4: memref<24x9xf32, #tpu.memory_space<vmem>>, %arg5: memref<24x1xf32, #tpu.memory_space<vmem>>, %arg6: memref<9x256xf32, #tpu.memory_space<vmem>>, %arg7: memref<4x24xf32, #tpu.memory_space<vmem>>, %arg8: memref<4x1xf32, #tpu.memory_space<vmem>>, %arg9: memref<1x4x256xf32, #tpu.memory_space<vmem>>) attributes {dimension_semantics = [#tpu.dimension_semantics<parallel>], iteration_bounds = array<i64: 2>, scalar_prefetch = 0 : i64, scratch_operands = 0 : i64, tpu.core_type = #tpu.core_type<tc>, window_params = [{transform_indices = @transform_0, window_bounds = array<i64: 1, 4, 256>}, {pipeline_mode = #tpu.pipeline_mode<synchronous>, transform_indices = @transform_1, window_bounds = array<i64: 24, 4>}, {pipeline_mode = #tpu.pipeline_mode<synchronous>, transform_indices = @transform_2, window_bounds = array<i64: 24, 1>}, {pipeline_mode = #tpu.pipeline_mode<synchronous>, transform_indices = @transform_3, window_bounds = array<i64: 24, 9>}, {pipeline_mode = #tpu.pipeline_mode<synchronous>, transform_indices = @transform_4, window_bounds = array<i64: 24, 1>}, {pipeline_mode = #tpu.pipeline_mode<synchronous>, transform_indices = @transform_5, window_bounds = array<i64: 9, 256>}, {pipeline_mode = #tpu.pipeline_mode<synchronous>, transform_indices = @transform_6, window_bounds = array<i64: 4, 24>}, {pipeline_mode = #tpu.pipeline_mode<synchronous>, transform_indices = @transform_7, window_bounds = array<i64: 4, 1>}, {transform_indices = @transform_8, window_bounds = array<i64: 1, 4, 256>}]} {
    %c0 = arith.constant 0 : index
    %c0_0 = arith.constant 0 : index
    %c0_1 = arith.constant 0 : index
    %0 = vector.load %arg1[%c0, %c0_0, %c0_1] : memref<1x4x256xf32, #tpu.memory_space<vmem>>, vector<1x4x256xf32>
    %1 = vector.shape_cast %0 : vector<1x4x256xf32> to vector<4x256xf32>
    %c0_2 = arith.constant 0 : index
    %c0_3 = arith.constant 0 : index
    %2 = vector.load %arg2[%c0_2, %c0_3] : memref<24x4xf32, #tpu.memory_space<vmem>>, vector<24x4xf32>
    %c0_4 = arith.constant 0 : index
    %c0_5 = arith.constant 0 : index
    %3 = vector.load %arg3[%c0_4, %c0_5] : memref<24x1xf32, #tpu.memory_space<vmem>>, vector<24x1xf32>
    %4 = vector.extract_strided_slice %2 {offsets = [0, 0], sizes = [24, 1], strides = [1, 1]} : vector<24x4xf32> to vector<24x1xf32>
    %5 = vector.extract_strided_slice %1 {offsets = [0, 0], sizes = [1, 256], strides = [1, 1]} : vector<4x256xf32> to vector<1x256xf32>
    %6 = vector.broadcast %4 : vector<24x1xf32> to vector<24x256xf32>
    %7 = vector.broadcast %5 : vector<1x256xf32> to vector<24x256xf32>
    %8 = arith.mulf %6, %7 : vector<24x256xf32>
    %9 = vector.broadcast %3 : vector<24x1xf32> to vector<24x256xf32>
    %10 = arith.addf %9, %8 : vector<24x256xf32>
    %11 = vector.extract_strided_slice %2 {offsets = [0, 1], sizes = [24, 1], strides = [1, 1]} : vector<24x4xf32> to vector<24x1xf32>
    %12 = vector.extract_strided_slice %1 {offsets = [1, 0], sizes = [1, 256], strides = [1, 1]} : vector<4x256xf32> to vector<1x256xf32>
    %13 = vector.broadcast %11 : vector<24x1xf32> to vector<24x256xf32>
    %14 = vector.broadcast %12 : vector<1x256xf32> to vector<24x256xf32>
    %15 = arith.mulf %13, %14 : vector<24x256xf32>
    %16 = arith.addf %10, %15 : vector<24x256xf32>
    %17 = vector.extract_strided_slice %2 {offsets = [0, 2], sizes = [24, 1], strides = [1, 1]} : vector<24x4xf32> to vector<24x1xf32>
    %18 = vector.extract_strided_slice %1 {offsets = [2, 0], sizes = [1, 256], strides = [1, 1]} : vector<4x256xf32> to vector<1x256xf32>
    %19 = vector.broadcast %17 : vector<24x1xf32> to vector<24x256xf32>
    %20 = vector.broadcast %18 : vector<1x256xf32> to vector<24x256xf32>
    %21 = arith.mulf %19, %20 : vector<24x256xf32>
    %22 = arith.addf %16, %21 : vector<24x256xf32>
    %23 = vector.extract_strided_slice %2 {offsets = [0, 3], sizes = [24, 1], strides = [1, 1]} : vector<24x4xf32> to vector<24x1xf32>
    %24 = vector.extract_strided_slice %1 {offsets = [3, 0], sizes = [1, 256], strides = [1, 1]} : vector<4x256xf32> to vector<1x256xf32>
    %25 = vector.broadcast %23 : vector<24x1xf32> to vector<24x256xf32>
    %26 = vector.broadcast %24 : vector<1x256xf32> to vector<24x256xf32>
    %27 = arith.mulf %25, %26 : vector<24x256xf32>
    %28 = arith.addf %22, %27 : vector<24x256xf32>
    %cst = arith.constant 0.000000e+00 : f32
    %29 = vector.broadcast %cst : f32 to vector<24x256xf32>
    %30 = arith.maximumf %28, %29 : vector<24x256xf32>
    %c0_6 = arith.constant 0 : index
    %c0_7 = arith.constant 0 : index
    %31 = vector.load %arg4[%c0_6, %c0_7] : memref<24x9xf32, #tpu.memory_space<vmem>>, vector<24x9xf32>
    %c0_8 = arith.constant 0 : index
    %c0_9 = arith.constant 0 : index
    %32 = vector.load %arg6[%c0_8, %c0_9] : memref<9x256xf32, #tpu.memory_space<vmem>>, vector<9x256xf32>
    %c0_10 = arith.constant 0 : index
    %c0_11 = arith.constant 0 : index
    %33 = vector.load %arg5[%c0_10, %c0_11] : memref<24x1xf32, #tpu.memory_space<vmem>>, vector<24x1xf32>
    %c17_i32 = arith.constant 17 : i32
    %34 = tpu.dynamic_rotate %30 by %c17_i32 dim 1 : vector<24x256xf32>, i32 -> vector<24x256xf32>
    %35 = vector.extract_strided_slice %31 {offsets = [0, 0], sizes = [24, 1], strides = [1, 1]} : vector<24x9xf32> to vector<24x1xf32>
    %36 = vector.extract_strided_slice %32 {offsets = [0, 0], sizes = [1, 256], strides = [1, 1]} : vector<9x256xf32> to vector<1x256xf32>
    %37 = vector.broadcast %35 : vector<24x1xf32> to vector<24x256xf32>
    %38 = vector.broadcast %36 : vector<1x256xf32> to vector<24x256xf32>
    %39 = arith.mulf %37, %38 : vector<24x256xf32>
    %40 = arith.mulf %34, %39 : vector<24x256xf32>
    %41 = vector.broadcast %33 : vector<24x1xf32> to vector<24x256xf32>
    %42 = arith.addf %41, %40 : vector<24x256xf32>
    %c16_i32 = arith.constant 16 : i32
    %43 = tpu.dynamic_rotate %30 by %c16_i32 dim 1 : vector<24x256xf32>, i32 -> vector<24x256xf32>
    %44 = vector.extract_strided_slice %31 {offsets = [0, 1], sizes = [24, 1], strides = [1, 1]} : vector<24x9xf32> to vector<24x1xf32>
    %45 = vector.extract_strided_slice %32 {offsets = [1, 0], sizes = [1, 256], strides = [1, 1]} : vector<9x256xf32> to vector<1x256xf32>
    %46 = vector.broadcast %44 : vector<24x1xf32> to vector<24x256xf32>
    %47 = vector.broadcast %45 : vector<1x256xf32> to vector<24x256xf32>
    %48 = arith.mulf %46, %47 : vector<24x256xf32>
    %49 = arith.mulf %43, %48 : vector<24x256xf32>
    %50 = arith.addf %42, %49 : vector<24x256xf32>
    %c15_i32 = arith.constant 15 : i32
    %51 = tpu.dynamic_rotate %30 by %c15_i32 dim 1 : vector<24x256xf32>, i32 -> vector<24x256xf32>
    %52 = vector.extract_strided_slice %31 {offsets = [0, 2], sizes = [24, 1], strides = [1, 1]} : vector<24x9xf32> to vector<24x1xf32>
    %53 = vector.extract_strided_slice %32 {offsets = [2, 0], sizes = [1, 256], strides = [1, 1]} : vector<9x256xf32> to vector<1x256xf32>
    %54 = vector.broadcast %52 : vector<24x1xf32> to vector<24x256xf32>
    %55 = vector.broadcast %53 : vector<1x256xf32> to vector<24x256xf32>
    %56 = arith.mulf %54, %55 : vector<24x256xf32>
    %57 = arith.mulf %51, %56 : vector<24x256xf32>
    %58 = arith.addf %50, %57 : vector<24x256xf32>
    %c1_i32 = arith.constant 1 : i32
    %59 = tpu.dynamic_rotate %30 by %c1_i32 dim 1 : vector<24x256xf32>, i32 -> vector<24x256xf32>
    %60 = vector.extract_strided_slice %31 {offsets = [0, 3], sizes = [24, 1], strides = [1, 1]} : vector<24x9xf32> to vector<24x1xf32>
    %61 = vector.extract_strided_slice %32 {offsets = [3, 0], sizes = [1, 256], strides = [1, 1]} : vector<9x256xf32> to vector<1x256xf32>
    %62 = vector.broadcast %60 : vector<24x1xf32> to vector<24x256xf32>
    %63 = vector.broadcast %61 : vector<1x256xf32> to vector<24x256xf32>
    %64 = arith.mulf %62, %63 : vector<24x256xf32>
    %65 = arith.mulf %59, %64 : vector<24x256xf32>
    %66 = arith.addf %58, %65 : vector<24x256xf32>
    %67 = vector.extract_strided_slice %31 {offsets = [0, 4], sizes = [24, 1], strides = [1, 1]} : vector<24x9xf32> to vector<24x1xf32>
    %68 = vector.extract_strided_slice %32 {offsets = [4, 0], sizes = [1, 256], strides = [1, 1]} : vector<9x256xf32> to vector<1x256xf32>
    %69 = vector.broadcast %67 : vector<24x1xf32> to vector<24x256xf32>
    %70 = vector.broadcast %68 : vector<1x256xf32> to vector<24x256xf32>
    %71 = arith.mulf %69, %70 : vector<24x256xf32>
    %72 = arith.mulf %30, %71 : vector<24x256xf32>
    %73 = arith.addf %66, %72 : vector<24x256xf32>
    %c255_i32 = arith.constant 255 : i32
    %74 = tpu.dynamic_rotate %30 by %c255_i32 dim 1 : vector<24x256xf32>, i32 -> vector<24x256xf32>
    %75 = vector.extract_strided_slice %31 {offsets = [0, 5], sizes = [24, 1], strides = [1, 1]} : vector<24x9xf32> to vector<24x1xf32>
    %76 = vector.extract_strided_slice %32 {offsets = [5, 0], sizes = [1, 256], strides = [1, 1]} : vector<9x256xf32> to vector<1x256xf32>
    %77 = vector.broadcast %75 : vector<24x1xf32> to vector<24x256xf32>
    %78 = vector.broadcast %76 : vector<1x256xf32> to vector<24x256xf32>
    %79 = arith.mulf %77, %78 : vector<24x256xf32>
    %80 = arith.mulf %74, %79 : vector<24x256xf32>
    %81 = arith.addf %73, %80 : vector<24x256xf32>
    %c241_i32 = arith.constant 241 : i32
    %82 = tpu.dynamic_rotate %30 by %c241_i32 dim 1 : vector<24x256xf32>, i32 -> vector<24x256xf32>
    %83 = vector.extract_strided_slice %31 {offsets = [0, 6], sizes = [24, 1], strides = [1, 1]} : vector<24x9xf32> to vector<24x1xf32>
    %84 = vector.extract_strided_slice %32 {offsets = [6, 0], sizes = [1, 256], strides = [1, 1]} : vector<9x256xf32> to vector<1x256xf32>
    %85 = vector.broadcast %83 : vector<24x1xf32> to vector<24x256xf32>
    %86 = vector.broadcast %84 : vector<1x256xf32> to vector<24x256xf32>
    %87 = arith.mulf %85, %86 : vector<24x256xf32>
    %88 = arith.mulf %82, %87 : vector<24x256xf32>
    %89 = arith.addf %81, %88 : vector<24x256xf32>
    %c240_i32 = arith.constant 240 : i32
    %90 = tpu.dynamic_rotate %30 by %c240_i32 dim 1 : vector<24x256xf32>, i32 -> vector<24x256xf32>
    %91 = vector.extract_strided_slice %31 {offsets = [0, 7], sizes = [24, 1], strides = [1, 1]} : vector<24x9xf32> to vector<24x1xf32>
    %92 = vector.extract_strided_slice %32 {offsets = [7, 0], sizes = [1, 256], strides = [1, 1]} : vector<9x256xf32> to vector<1x256xf32>
    %93 = vector.broadcast %91 : vector<24x1xf32> to vector<24x256xf32>
    %94 = vector.broadcast %92 : vector<1x256xf32> to vector<24x256xf32>
    %95 = arith.mulf %93, %94 : vector<24x256xf32>
    %96 = arith.mulf %90, %95 : vector<24x256xf32>
    %97 = arith.addf %89, %96 : vector<24x256xf32>
    %c239_i32 = arith.constant 239 : i32
    %98 = tpu.dynamic_rotate %30 by %c239_i32 dim 1 : vector<24x256xf32>, i32 -> vector<24x256xf32>
    %99 = vector.extract_strided_slice %31 {offsets = [0, 8], sizes = [24, 1], strides = [1, 1]} : vector<24x9xf32> to vector<24x1xf32>
    %100 = vector.extract_strided_slice %32 {offsets = [8, 0], sizes = [1, 256], strides = [1, 1]} : vector<9x256xf32> to vector<1x256xf32>
    %101 = vector.broadcast %99 : vector<24x1xf32> to vector<24x256xf32>
    %102 = vector.broadcast %100 : vector<1x256xf32> to vector<24x256xf32>
    %103 = arith.mulf %101, %102 : vector<24x256xf32>
    %104 = arith.mulf %98, %103 : vector<24x256xf32>
    %105 = arith.addf %97, %104 : vector<24x256xf32>
    %cst_12 = arith.constant 0.000000e+00 : f32
    %106 = vector.broadcast %cst_12 : f32 to vector<24x256xf32>
    %107 = arith.maximumf %105, %106 : vector<24x256xf32>
    %c0_13 = arith.constant 0 : index
    %c0_14 = arith.constant 0 : index
    %108 = vector.load %arg7[%c0_13, %c0_14] : memref<4x24xf32, #tpu.memory_space<vmem>>, vector<4x24xf32>
    %cst_15 = arith.constant dense<0.000000e+00> : vector<4x256xf32>
    %109 = tpu.matmul %108, %107, %cst_15 {dimension_numbers = #tpu.dot_dimension_numbers<[1], [0], [0], [1], [0, 0, 1, 1], [], []>} : vector<4x24xf32>, vector<24x256xf32>, vector<4x256xf32> -> vector<4x256xf32>
    %c0_16 = arith.constant 0 : index
    %c0_17 = arith.constant 0 : index
    %110 = vector.load %arg8[%c0_16, %c0_17] : memref<4x1xf32, #tpu.memory_space<vmem>>, vector<4x1xf32>
    %111 = vector.broadcast %110 : vector<4x1xf32> to vector<4x256xf32>
    %112 = arith.addf %109, %111 : vector<4x256xf32>
    %cst_18 = arith.constant 0.000000e+00 : f32
    %113 = vector.broadcast %cst_18 : f32 to vector<4x256xf32>
    %114 = arith.maximumf %112, %113 : vector<4x256xf32>
    %115 = arith.addf %114, %1 : vector<4x256xf32>
    %c0_19 = arith.constant 0 : index
    %c0_20 = arith.constant 0 : index
    %c0_21 = arith.constant 0 : index
    %116 = vector.load %arg9[%c0_19, %c0_20, %c0_21] : memref<1x4x256xf32, #tpu.memory_space<vmem>>, vector<1x4x256xf32>
    %117 = vector.shape_cast %116 : vector<1x4x256xf32> to vector<4x256xf32>
    %118 = vector.shape_cast %115 : vector<4x256xf32> to vector<1x4x256xf32>
    tpu.vector_store %arg9[%c0_19, %c0_20, %c0_21], %118 {strides = array<i32>} : memref<1x4x256xf32, #tpu.memory_space<vmem>>, vector<1x4x256xf32>,
    return
  }
  func.func @transform_0(%arg0: i32) -> (i32, i32, i32) {
    %c0_i32 = arith.constant 0 : i32
    %c0_i32_0 = arith.constant 0 : i32
    %c0_i32_1 = arith.constant 0 : i32
    return %arg0, %c0_i32, %c0_i32_0 : i32, i32, i32
  }
  func.func @transform_1(%arg0: i32) -> (i32, i32) {
    %c0_i32 = arith.constant 0 : i32
    %c0_i32_0 = arith.constant 0 : i32
    %c0_i32_1 = arith.constant 0 : i32
    return %c0_i32, %c0_i32_0 : i32, i32
  }
  func.func @transform_2(%arg0: i32) -> (i32, i32) {
    %c0_i32 = arith.constant 0 : i32
    %c0_i32_0 = arith.constant 0 : i32
    %c0_i32_1 = arith.constant 0 : i32
    return %c0_i32, %c0_i32_0 : i32, i32
  }
  func.func @transform_3(%arg0: i32) -> (i32, i32) {
    %c0_i32 = arith.constant 0 : i32
    %c0_i32_0 = arith.constant 0 : i32
    %c0_i32_1 = arith.constant 0 : i32
    return %c0_i32, %c0_i32_0 : i32, i32
  }
  func.func @transform_4(%arg0: i32) -> (i32, i32) {
    %c0_i32 = arith.constant 0 : i32
    %c0_i32_0 = arith.constant 0 : i32
    %c0_i32_1 = arith.constant 0 : i32
    return %c0_i32, %c0_i32_0 : i32, i32
  }
  func.func @transform_5(%arg0: i32) -> (i32, i32) {
    %c0_i32 = arith.constant 0 : i32
    %c0_i32_0 = arith.constant 0 : i32
    %c0_i32_1 = arith.constant 0 : i32
    return %c0_i32, %c0_i32_0 : i32, i32
  }
  func.func @transform_6(%arg0: i32) -> (i32, i32) {
    %c0_i32 = arith.constant 0 : i32
    %c0_i32_0 = arith.constant 0 : i32
    %c0_i32_1 = arith.constant 0 : i32
    return %c0_i32, %c0_i32_0 : i32, i32
  }
  func.func @transform_7(%arg0: i32) -> (i32, i32) {
    %c0_i32 = arith.constant 0 : i32
    %c0_i32_0 = arith.constant 0 : i32
    %c0_i32_1 = arith.constant 0 : i32
    return %c0_i32, %c0_i32_0 : i32, i32
  }
  func.func @transform_8(%arg0: i32) -> (i32, i32, i32) {
    %c0_i32 = arith.constant 0 : i32
    %c0_i32_0 = arith.constant 0 : i32
    %c0_i32_1 = arith.constant 0 : i32
    return %arg0, %c0_i32, %c0_i32_0 : i32, i32, i32
  }
}

</mosaic_0001>

<bundles_post_ra>
// kernel: tpu_custom_call.1
= control target key start
LH: loop header
LB: loop body
LE: loop exit
PB: predicated region body
PF: predicated region fallthrough
CT: control target
= control target key end

     0   :  { %13 = vsyncpa [#allocation3], 0  ;;  %s2202_s0 = inlined_call_operand.vmem [shape: f32[2,4,256], index: 0, kind: input, shape index: {}]   ;;  %s2203_s1 = inlined_call_operand.vmem [shape: f32[24,4], index: 1, kind: input, shape index: {}]   ;;  %s2204_s2 = inlined_call_operand.vmem [shape: f32[24,1], index: 2, kind: input, shape index: {}]   ;;  %s2205_s3 = inlined_call_operand.vmem [shape: f32[24,9], index: 3, kind: input, shape index: {}]   ;;  %s2206_s4 = inlined_call_operand.vmem [shape: f32[24,1], index: 4, kind: input, shape index: {}]   ;;  %s2207_s5 = inlined_call_operand.vmem [shape: f32[9,256], index: 5, kind: input, shape index: {}]   ;;  %s2208_s6 = inlined_call_operand.vmem [shape: f32[4,24], index: 6, kind: input, shape index: {}]   ;;  %s2209_s7 = inlined_call_operand.vmem [shape: f32[4,1], index: 7, kind: input, shape index: {}]   ;;  %s2210_s8 = inlined_call_operand.hbm [shape: f32[2,4,256], index: 8, kind: output, shape index: {}]  }
   0x1   :  { %15 = vsyncpa [#allocation3 + $0x1], 0  ;;  %s1439_s27 = smov 0   ;;  %s1441_s28 = smov 0  }
   0x2   :  { %s1443_s29 = smov 0   ;;  %s1445_s30 = smov 0  }
   0x3 LB: > { %s1460_s9 = sadd.s32 4294967295, %s1373_s30   ;;  %s1201_s10 = sadd.s32 4294967294, %s1373_s30   ;;  %s1373_s30 = sphi %s1445_s30, %s2233_s30   ;;  %s1369_s29 = sphi %s1443_s29, %s2232_s29   ;;  %s1365_s28 = sphi %s1441_s28, %s2231_s28   ;;  %s1361_s27 = sphi %s1439_s27, %s2230_s27  }
   0x4   : > { %s1464_s11 = sadd.s32 1, %s1373_s30   ;;  %s201_s12 = sadd.s32 1, %s1369_s29 }
   0x5   : > { %s198_s13 = ssub.s32 %s1373_s30, %s1464_s11  ;;  %p211_p0 = scmp.ne.s32.totalorder %s1369_s29, %s1365_s28 }
   0x6   : > { %p199_p1 = scmp.eq.s32.totalorder %s198_s13, 0  ;;  %p212_p2 = scmp.eq.s32.totalorder %s1460_s9, 1 }
   0x7   : > { %p217_p3 = scmp.ne.s32.totalorder %s1365_s28, %s1361_s27  ;;  %p218_p4 = scmp.eq.s32.totalorder %s1201_s10, 1 }
   0x8   : > { %s1475_s14 = scalar_select %p199_p1, %s1369_s29, %s201_s12  }
   0x9   : > { %p1477_p5 = por %p212_p2, %p211_p0  ;;  %p1481_p6 = por %p218_p4, %p217_p3 }
   0xa   : > { %p1204_p7 = scmp.ge.s32.totalorder %s1373_s30, 1  ;;  %p265_p8 = scmp.lt.s32.totalorder %s1373_s30, 3 }
   0xc   : > { %p266_p9 = pnand %p1204_p7, %p265_p8 }
   0xe   : > { %269 = sbr.rel (%p266_p9) target bundleno = 672 (0x2a0), region = 52 }
  0x15   : > { %v308_v0 = vld [vmem:[%s2204_s2] sm:$0xff]  ;;  %v1375_v2 = vmov 1   ;;  %v1376_v3 = vmov 0   ;;  %v309_v4 = vld [vmem:[%s2204_s2 + $0x8] sm:$0xff]  ;;  %v1377_v7 = vmov 2   ;;  %v307_v9 = vld [vmem:[%s2203_s1 + $0x10] sm:$0xff]  ;;  %v327_v21 = vlaneseq }
  0x16   : > { %v305_v1 = vld [vmem:[%s2203_s1] sm:$0xff]  ;;  %1280 = vset.pattern.permute.xlu0 %v1375_v2  ;;  %1279 = vset.pattern.permute.xlu1 %v1376_v3  ;;  %v306_v5 = vld [vmem:[%s2203_s1 + $0x8] sm:$0xff]  ;;  %v1378_v10 = vmov 3   ;;  %v310_v11 = vld [vmem:[%s2204_s2 + $0x10] sm:$0xff]  ;;  %v1379_v14 = vmov 4   ;;  %v1380_v16 = vmov 5  }
  0x17   : > { %353 = vperm.xlu1 %1279, %v308_v0   ;;  %373 = vperm.xlu0 %1280, %v305_v1   ;;  %v1506_v6 = vld [vmem:[%s2205_s3 + $0x8] sm:$0xff]  ;;  %v511_v8 = vld [vmem:[%s2206_s4] sm:$0xff]  ;;  %v1529_v13 = vld [vmem:[%s2205_s3 + $0x10] sm:$0xff]  ;;  %v1381_v18 = vmov 6   ;;  %v1382_v19 = vmov 7   ;;  %p299_p10 = scmp.lt.s32.totalorder %s1460_s9, 1 }
  0x18   : > { %v1522_v12 = vld [vmem:[%s2205_s3] sm:$0xff]  ;;  %v512_v15 = vld [vmem:[%s2206_s4 + $0x8] sm:$0xff]  ;;  %v513_v17 = vld [vmem:[%s2206_s4 + $0x10] sm:$0xff]  ;;  %v1383_v20 = vmov 8   ;;  %v328_v24 = vshrl.u32 %v327_v21, 7  ;;  %s1384_s24 = smov 17  }
  0x19   : > { %s300_s12 = scalar_select %p299_p10, %s1460_s9, 1  ;;  %v1582_v31 = vld [vmem:[%s2207_s5] sm:$0xff]  ;;  %v1587_v32 = vld [vmem:[%s2207_s5 + $0x8] sm:$0xff]  ;;  %vm1041_vm8 = vcmask 195584  }
  0x1a   : > { %v329_v25 = vsub.s32 0, %v328_v24  ;;  %v1574_v27 = vsub.s32 4, %v328_v24  ;;  %v1589_v33 = vsub.s32 1, %v328_v24  ;;  %v428_v37 = vsub.s32 2, %v328_v24  ;;  %s1385_s25 = smov 16   ;;  %s1386_s26 = smov 15  }
  0x1b   : > { %358 = vperm.xlu1 %1279, %v309_v4   ;;  %1281 = vset.pattern.permute.xlu0 %v1376_v3  ;;  %s1216_s13 = sshll.u32 %s300_s12, 3  ;;  %v1601_v40 = vsub.s32 5, %v328_v24  ;;  %v1605_v42 = vsub.s32 6, %v328_v24  ;;  %v1607_v43 = vsub.s32 3, %v328_v24  ;;  %v1614_v48 = vsub.s32 7, %v328_v24  ;;  %s1387_s10 = smov 1  }
  0x1c   : > { %313 = vperm.xlu0 %1281, %v305_v1   ;;  %s303_s19 = scalar_lea.vmem %s2202_s0, %s1216_s13  ;;  %v1596_v38 = vrot.slane %v1582_v31, %v329_v25  ;;  %v1599_v39 = vrot.slane %v1587_v32, %v329_v25  ;;  %s1388_s12 = smov 127  }
  0x1d   : > { %v1576_v29 = vld [vmem:[%s303_s19] sm:$0xff]  ;;  %2221 = vst [vmem:[#allocation6_spill] sm:$0xff] %v1614_v48  ;;  %s1389_s13 = smov 113   ;;  %s1390_s17 = smov 112  }
  0x1e   : > { %2220 = vst [vmem:[#allocation5_spill] sm:$0xff] %v1576_v29  ;;  %v330_v30 = vrot.slane %v1576_v29, %v329_v25  ;;  %v334_v34 = vrot.slane %v1576_v29, %v1574_v27  ;;  %v387_v44 = vrot.slane %v1576_v29, %v1589_v33  ;;  %v429_v47 = vrot.slane %v1576_v29, %v428_v37  ;;  %s1391_s18 = smov 111  }
  0x1f   : > { %1282 = vset.pattern.permute.xlu1 %v1375_v2  ;;  %v391_v51 = vrot.slane %v1576_v29, %v1601_v40  ;;  %v433_v54 = vrot.slane %v1576_v29, %v1605_v42  ;;  %v471_v55 = vrot.slane %v1576_v29, %v1607_v43  ;;  %v475_v60 = vrot.slane %v1576_v29, %v1614_v48 }
  0x20   : > { %377 = vperm.xlu1 %1282, %v306_v5   ;;  %318 = vperm.xlu0 %1281, %v306_v5   ;;  %v1603_v41 = vrot.slane %v330_v30, %v329_v25  ;;  %v1611_v45 = vrot.slane %v334_v34, %v329_v25  ;;  %v1630_v56 = vrot.slane %v387_v44, %v1589_v33 }
  0x21   : > { %v1633_v58 = vrot.slane %v429_v47, %v428_v37  ;;  %v401_v61 = vrot.slane %v391_v51, %v1589_v33  ;;  %v1640_v63 = vrot.slane %v433_v54, %v428_v37  ;;  %v1658_v30 = vrot.slane %v1582_v31, %v428_v37 }
  0x22   : > { %v1661_v34 = vrot.slane %v1587_v32, %v428_v37 }
  0x24   : > { %1283 = vset.pattern.permute.xlu1 %v1377_v7  ;;  %542 = vperm.xlu0 %1281, %v1506_v6  }
  0x25   : > { %415 = vperm.xlu1 %1283, %v305_v1  }
  0x28   : > { %572 = vperm.xlu0 %1281, %v511_v8  }
  0x29   : > { %1284 = vset.pattern.permute.xlu1 %v1376_v3 }
  0x2a   : > { %323 = vperm.xlu1 %1284, %v307_v9  }
  0x2c   : > { %1291 = vset.pattern.permute.xlu0 %v1377_v7 }
  0x2d   : > { %419 = vperm.xlu0 %1291, %v306_v5  }
  0x2e   : > { %1285 = vset.pattern.permute.xlu1 %v1378_v10 }
  0x2f   : > { %457 = vperm.xlu1 %1285, %v305_v1   ;;  %v1645_v1 = vrot.slane %v471_v55, %v1607_v43 }
  0x31   : > { %423 = vperm.xlu0 %1291, %v307_v9  }
  0x33   : > { %1286 = vset.pattern.permute.xlu1 %v1376_v3 }
  0x34   : > { %363 = vperm.xlu1 %1286, %v310_v11  }
  0x35   : > { %668 = vperm.xlu0 %1291, %v1522_v12  }
  0x38   : > { %1287 = vset.pattern.permute.xlu1 %v1375_v2 }
  0x39   : > { %381 = vperm.xlu1 %1287, %v307_v9   ;;  %676 = vperm.xlu0 %1291, %v1529_v13  }
  0x3d   : > { %1288 = vset.pattern.permute.xlu1 %v1378_v10  ;;  %1299 = vset.pattern.permute.xlu0 %v1378_v10 }
  0x3e   : > { %465 = vperm.xlu1 %1288, %v307_v9   ;;  %461 = vperm.xlu0 %1299, %v306_v5  }
  0x42   : > { %1289 = vset.pattern.permute.xlu1 %v1376_v3  ;;  %725 = vperm.xlu0 %1299, %v1522_v12  }
  0x43   : > { %537 = vperm.xlu1 %1289, %v1522_v12  }
  0x46   : > { %733 = vperm.xlu0 %1299, %v1529_v13  }
  0x47   : > { %1290 = vset.pattern.permute.xlu1 %v1375_v2 }
  0x48   : > { %611 = vperm.xlu1 %1290, %v1522_v12  }
  0x4a   : > { %1301 = vset.pattern.permute.xlu0 %v1379_v14 }
  0x4b   : > { %763 = vperm.xlu0 %1301, %v1522_v12  }
  0x4c   : > { %615 = vperm.xlu1 %1290, %v1506_v6  }
  0x4f   : > { %771 = vperm.xlu0 %1301, %v1529_v13  }
  0x50   : > { %1292 = vset.pattern.permute.xlu1 %v1376_v3 }
  0x51   : > { %577 = vperm.xlu1 %1292, %v512_v15  }
  0x53   : > { %1304 = vset.pattern.permute.xlu0 %v1380_v16 }
  0x55   : > { %1293 = vset.pattern.permute.xlu1 %v1377_v7  ;;  %v1650_v7 = vrot.slane %v475_v60, %v1607_v43 }
  0x56   : > { %672 = vperm.xlu1 %1293, %v1506_v6  }
  0x5a   : > { %1294 = vset.pattern.permute.xlu1 %v1376_v3 }
  0x5b   : > { %547 = vperm.xlu1 %1294, %v1529_v13  }
  0x5f   : > { %1295 = vset.pattern.permute.xlu1 %v1378_v10 }
  0x60   : > { %729 = vperm.xlu1 %1295, %v1506_v6  }
  0x64   : > { %1296 = vset.pattern.permute.xlu1 %v1375_v2 }
  0x65   : > { %619 = vperm.xlu1 %1296, %v1529_v13  }
  0x69   : > { %1297 = vset.pattern.permute.xlu1 %v1379_v14 }
  0x6a   : > { %767 = vperm.xlu1 %1297, %v1506_v6  }
  0x6e   : > { %1298 = vset.pattern.permute.xlu1 %v1376_v3 }
  0x6f   : > { %582 = vperm.xlu1 %1298, %v513_v17  }
  0x73   : > { %1300 = vset.pattern.permute.xlu1 %v1380_v16 }
  0x74   : > { %820 = vperm.xlu1 %1300, %v1522_v12  }
  0x78   : > { %824 = vperm.xlu1 %1300, %v1506_v6  }
  0x7c   : > { %1302 = vset.pattern.permute.xlu1 %v1381_v18 }
  0x7d   : > { %877 = vperm.xlu1 %1302, %v1522_v12  }
  0x81   : > { %881 = vperm.xlu1 %1302, %v1506_v6  }
  0x85   : > { %1303 = vset.pattern.permute.xlu1 %v1382_v19 }
  0x86   : > { %934 = vperm.xlu1 %1303, %v1522_v12  }
  0x8a   : > { %938 = vperm.xlu1 %1303, %v1506_v6  }
  0x8e   : > { %1305 = vset.pattern.permute.xlu1 %v1383_v20 }
  0x96   : > { %v374_v22 = vpop.permute.xlu0 %373  ;;  %v354_v23 = vpop.permute.xlu1 %353 }
  0x97   : > { %v402_v2 = vmul.f32 %v1630_v56, %v374_v22  ;;  %v403_v9 = vmul.f32 %v401_v61, %v374_v22 }
  0x9a   : > { %v1572_v26 = vpop.permute.xlu1 %358 }
  0x9b   : > { %v314_v28 = vpop.permute.xlu0 %313 }
  0x9c   : > { %v345_v52 = vmul.f32 %v1603_v41, %v314_v28  ;;  %v346_v57 = vmul.f32 %v1611_v45, %v314_v28 }
  0x9e   : > { %v366_v62 = vadd.f32 %v354_v23, %v345_v52  ;;  %v367_v4 = vadd.f32 %v354_v23, %v346_v57 }
  0x9f   : > { %v319_v35 = vpop.permute.xlu0 %318  ;;  %v1593_v36 = vpop.permute.xlu1 %377 }
  0xa0   : > { %v408_v10 = vadd.f32 %v402_v2, %v366_v62  ;;  %v409_v15 = vadd.f32 %v403_v9, %v367_v4  ;;  %v347_v47 = vmul.f32 %v1603_v41, %v319_v35  ;;  %v348_v37 = vmul.f32 %v1611_v45, %v319_v35 }
  0xa1   : > { %v404_v57 = vmul.f32 %v1630_v56, %v1593_v36 }
  0xa2   : > { %v368_v55 = vadd.f32 %v1572_v26, %v347_v47  ;;  %v369_v35 = vadd.f32 %v1572_v26, %v348_v37  ;;  %v1702_v26 = vrot.slane %v1587_v32, %v1607_v43 }
  0xa3   : > { %v543_v46 = vpop.permute.xlu0 %542 }
  0xa4   : > { %v1617_v49 = vmul.f32 %v1596_v38, %v543_v46  ;;  %v1620_v50 = vmul.f32 %v1599_v39, %v543_v46  ;;  %v416_v53 = vpop.permute.xlu1 %415 }
  0xa5   : > { %v444_v5 = vmul.f32 %v1633_v58, %v416_v53  ;;  %v445_v11 = vmul.f32 %v1640_v63, %v416_v53 }
  0xa7   : > { %v1635_v59 = vpop.permute.xlu0 %572  ;;  %v450_v16 = vadd.f32 %v444_v5, %v408_v10  ;;  %v451_v23 = vadd.f32 %v445_v11, %v409_v15  ;;  %v405_v5 = vmul.f32 %v401_v61, %v1593_v36  ;;  %v410_v10 = vadd.f32 %v404_v57, %v368_v55 }
  0xa9   : > { %v1642_v0 = vpop.permute.xlu1 %323  ;;  %v411_v15 = vadd.f32 %v405_v5, %v369_v35 }
  0xaa   : > { %v350_v36 = vmul.f32 %v1611_v45, %v1642_v0 }
  0xac   : > { %v420_v8 = vpop.permute.xlu0 %419 }
  0xad   : > { %v446_v9 = vmul.f32 %v1633_v58, %v420_v8  ;;  %v447_v11 = vmul.f32 %v1640_v63, %v420_v8 }
  0xae   : > { %v458_v14 = vpop.permute.xlu1 %457 }
  0xaf   : > { %v486_v17 = vmul.f32 %v1645_v1, %v458_v14  ;;  %v487_v24 = vmul.f32 %v1650_v7, %v458_v14  ;;  %v453_v8 = vadd.f32 %v447_v11, %v411_v15 }
  0xb0   : > { %v1655_v25 = vpop.permute.xlu0 %423 }
  0xb1   : > { %v492_v28 = vadd.f32 %v486_v17, %v450_v16  ;;  %v493_v22 = vadd.f32 %v487_v24, %v451_v23  ;;  %v452_v16 = vadd.f32 %v446_v9, %v410_v10  ;;  %v629_v9 = vrot.slane %v1587_v32, %v1589_v33 }
  0xb3   : > { %v1663_v44 = vmax.f32 %v492_v28, 0.0  ;;  %v1665_v46 = vpop.permute.xlu1 %363  ;;  %v1677_v54 = vmax.f32 %v493_v22, 0.0  ;;  %v1698_v28 = vrot.slane %v1582_v31, %v1607_v43 }
  0xb4   : > { %v669_v51 = vpop.permute.xlu0 %668  ;;  %v371_v45 = vadd.f32 %v1665_v46, %v350_v36 }
  0xb5   : > { %v1669_v52 = vmul.f32 %v1658_v30, %v669_v51  ;;  %v1672_v53 = vmul.f32 %v1661_v34, %v669_v51  ;;  %514 = vrot.lane.b32.xlu1 %v1663_v44, %s1384_s24 }
  0xb8   : > { %v382_v60 = vpop.permute.xlu1 %381  ;;  %v677_v62 = vpop.permute.xlu0 %676 }
  0xb9   : > { %v1683_v2 = vmul.f32 %v1658_v30, %v677_v62  ;;  %v1686_v4 = vmul.f32 %v1661_v34, %v677_v62  ;;  %520 = vrot.lane.b32.xlu1 %v1677_v54, %s1384_s24  ;;  %v407_v51 = vmul.f32 %v401_v61, %v382_v60  ;;  %v625_v61 = vrot.slane %v1582_v31, %v1589_v33 }
  0xba   : > { %v1745_v33 = vrot.slane %v1587_v32, %v1574_v27 }
  0xbb   : > { %v413_v11 = vadd.f32 %v407_v51, %v371_v45 }
  0xbd   : > { %v462_v14 = vpop.permute.xlu0 %461  ;;  %v466_v17 = vpop.permute.xlu1 %465 }
  0xbe   : > { %v488_v24 = vmul.f32 %v1645_v1, %v462_v14  ;;  %v489_v23 = vmul.f32 %v1650_v7, %v462_v14 }
  0xc0   : > { %v494_v22 = vadd.f32 %v488_v24, %v452_v16  ;;  %v495_v37 = vadd.f32 %v489_v23, %v453_v8  ;;  %v349_v24 = vmul.f32 %v1603_v41, %v1642_v0  ;;  %v1741_v23 = vrot.slane %v1582_v31, %v1574_v27 }
  0xc1   : > { %v726_v47 = vpop.permute.xlu0 %725  ;;  %v449_v8 = vmul.f32 %v1640_v63, %v1655_v25  ;;  %v406_v0 = vmul.f32 %v1630_v56, %v382_v60  ;;  %v491_v27 = vmul.f32 %v1650_v7, %v466_v17 }
  0xc2   : > { %v1706_v55 = vmax.f32 %v494_v22, 0.0  ;;  %v538_v57 = vpop.permute.xlu1 %537  ;;  %v1709_v62 = vmul.f32 %v1698_v28, %v726_v47  ;;  %v1712_v35 = vmul.f32 %v1702_v26, %v726_v47  ;;  %v1729_v14 = vmax.f32 %v495_v37, 0.0 }
  0xc3   : > { %v1715_v43 = vmul.f32 %v1596_v38, %v538_v57  ;;  %v1718_v5 = vmul.f32 %v1599_v39, %v538_v57  ;;  %v455_v47 = vadd.f32 %v449_v8, %v413_v11  ;;  %v370_v45 = vadd.f32 %v1665_v46, %v349_v24 }
  0xc4   : > { %516 = vrot.lane.b32.xlu0 %v1706_v55, %s1384_s24  ;;  %593 = vrot.lane.b32.xlu1 %v1706_v55, %s1385_s25  ;;  %v448_v11 = vmul.f32 %v1633_v58, %v1655_v25 }
  0xc5   : > { %v734_v10 = vpop.permute.xlu0 %733  ;;  %v412_v60 = vadd.f32 %v406_v0, %v370_v45 }
  0xc6   : > { %v1732_v15 = vmul.f32 %v1698_v28, %v734_v10  ;;  %v1735_v16 = vmul.f32 %v1702_v26, %v734_v10  ;;  %v497_v10 = vadd.f32 %v491_v27, %v455_v47 }
  0xc7   : > { %v612_v36 = vpop.permute.xlu1 %611  ;;  %v454_v24 = vadd.f32 %v448_v11, %v412_v60 }
  0xc8   : > { %522 = vrot.lane.b32.xlu0 %v1729_v14, %s1384_s24  ;;  %599 = vrot.lane.b32.xlu1 %v1729_v14, %s1385_s25  ;;  %v1753_v22 = vmul.f32 %v625_v61, %v612_v36  ;;  %v1755_v41 = vmul.f32 %v629_v9, %v612_v36  ;;  %v490_v36 = vmul.f32 %v1645_v1, %v466_v17  ;;  %v1783_v8 = vmax.f32 %v497_v10, 0.0 }
  0xca   : > { %v764_v51 = vpop.permute.xlu0 %763  ;;  %v496_v25 = vadd.f32 %v490_v36, %v454_v24 }
  0xcb   : > { %v1760_v37 = vmul.f32 %v1741_v23, %v764_v51  ;;  %v1763_v63 = vmul.f32 %v1745_v33, %v764_v51  ;;  %v616_v57 = vpop.permute.xlu1 %615 }
  0xcc   : > { %591 = vrot.lane.b32.xlu0 %v1663_v44, %s1385_s25  ;;  %650 = vrot.lane.b32.xlu1 %v1706_v55, %s1386_s26  ;;  %v1770_v56 = vmul.f32 %v625_v61, %v616_v57  ;;  %v1772_v7 = vmul.f32 %v629_v9, %v616_v57  ;;  %v1799_v1 = vmax.f32 %v496_v25, 0.0  ;;  %v1392_v25 = vmov 0.0  }
  0xcd   : > { %1109 = vmatprep.mubr.f32.mxu0 %v1392_v25 }
  0xd0   : > { %597 = vrot.lane.b32.xlu0 %v1677_v54, %s1385_s25  ;;  %656 = vrot.lane.b32.xlu1 %v1729_v14, %s1386_s26  ;;  %v1780_v46 = vpop.permute.xlu1 %577 }
  0xd4   : > { %648 = vrot.lane.b32.xlu0 %v1663_v44, %s1386_s26  ;;  %524 = vrot.lane.b32.xlu1 %v1783_v8, %s1384_s24 }
  0xd5   : > { %v673_v58 = vpop.permute.xlu1 %672 }
  0xd6   : > { %v1790_v0 = vmul.f32 %v1658_v30, %v673_v58  ;;  %v1793_v47 = vmul.f32 %v1661_v34, %v673_v58 }
  0xd8   : > { %654 = vrot.lane.b32.xlu0 %v1677_v54, %s1386_s26  ;;  %707 = vrot.lane.b32.xlu1 %v1706_v55, %s1387_s10 }
  0xda   : > { %v548_v17 = vpop.permute.xlu1 %547 }
  0xdb   : > { %v1802_v27 = vmul.f32 %v1596_v38, %v548_v17  ;;  %v1805_v51 = vmul.f32 %v1599_v39, %v548_v17  ;;  %v1035_v17 = vld [vmem:[%s2209_s7] sm:$0xf] }
  0xdc   : > { %518 = vrot.lane.b32.xlu0 %v1799_v1, %s1384_s24  ;;  %713 = vrot.lane.b32.xlu1 %v1729_v14, %s1387_s10 }
  0xdf   : > { %v730_v30 = vpop.permute.xlu1 %729 }
  0xe0   : > { %705 = vrot.lane.b32.xlu0 %v1663_v44, %s1387_s10  ;;  %991 = vperm.xlu1 %1305, %v1522_v12   ;;  %v1815_v34 = vmul.f32 %v1698_v28, %v730_v30  ;;  %v1818_v38 = vmul.f32 %v1702_v26, %v730_v30 }
  0xe4   : > { %711 = vrot.lane.b32.xlu0 %v1677_v54, %s1387_s10  ;;  %601 = vrot.lane.b32.xlu1 %v1783_v8, %s1385_s25  ;;  %v620_v39 = vpop.permute.xlu1 %619 }
  0xe5   : > { %v1824_v57 = vmul.f32 %v625_v61, %v620_v39  ;;  %v1826_v45 = vmul.f32 %v629_v9, %v620_v39 }
  0xe8   : > { %595 = vrot.lane.b32.xlu0 %v1799_v1, %s1385_s25  ;;  %995 = vperm.xlu1 %1305, %v1506_v6  }
  0xe9   : > { %v768_v12 = vpop.permute.xlu1 %767 }
  0xea   : > { %v1832_v28 = vmul.f32 %v1741_v23, %v768_v12  ;;  %v1835_v26 = vmul.f32 %v1745_v33, %v768_v12 }
  0xec   : > { %828 = vperm.xlu0 %1304, %v1529_v13   ;;  %658 = vrot.lane.b32.xlu1 %v1783_v8, %s1386_s26 }
  0xee   : > { %v1856_v6 = vpop.permute.xlu1 %582 }
  0xf0   : > { %652 = vrot.lane.b32.xlu0 %v1799_v1, %s1386_s26  ;;  %802 = vrot.lane.b32.xlu1 %v1706_v55, %s1388_s12 }
  0xf1   : > { %1306 = vset.pattern.permute.xlu0 %v1381_v18 }
  0xf3   : > { %v1863_v18 = vpop.permute.xlu1 %820 }
  0xf4   : > { %800 = vrot.lane.b32.xlu0 %v1663_v44, %s1388_s12  ;;  %808 = vrot.lane.b32.xlu1 %v1729_v14, %s1388_s12 }
  0xf7   : > { %v1871_v61 = vpop.permute.xlu1 %824 }
  0xf8   : > { %806 = vrot.lane.b32.xlu0 %v1677_v54, %s1388_s12  ;;  %709 = vrot.lane.b32.xlu1 %v1799_v1, %s1387_s10 }
  0xfc   : > { %885 = vperm.xlu0 %1306, %v1529_v13   ;;  %715 = vrot.lane.b32.xlu1 %v1783_v8, %s1387_s10  ;;  %s296_s10 = sand.u32 1, %s1365_s28  }
  0xfd   : > { %s1128_s22 = scalar_lea.sflag [#allocation3], %s296_s10 }
 0x100   : > { %857 = vrot.lane.b32.xlu0 %v1663_v44, %s1389_s13  ;;  %859 = vrot.lane.b32.xlu1 %v1706_v55, %s1389_s13 }
 0x101   : > { %1307 = vset.pattern.permute.xlu0 %v1382_v19  ;;  %v1876_v19 = vpop.permute.xlu1 %877 }
 0x104   : > { %863 = vrot.lane.b32.xlu0 %v1677_v54, %s1389_s13  ;;  %865 = vrot.lane.b32.xlu1 %v1729_v14, %s1389_s13 }
 0x105   : > { %v1883_v9 = vpop.permute.xlu1 %881 }
 0x106   : > { %2222 = vst [vmem:[#allocation7_spill] sm:$0xff] %v1883_v9 }
 0x108   : > { %942 = vperm.xlu0 %1307, %v1529_v13   ;;  %914 = vrot.lane.b32.xlu1 %v1663_v44, %s1390_s17 }
 0x10c   : > { %920 = vrot.lane.b32.xlu0 %v1677_v54, %s1390_s17  ;;  %916 = vrot.lane.b32.xlu1 %v1706_v55, %s1390_s17 }
 0x10d   : > { %1308 = vset.pattern.permute.xlu0 %v1383_v20  ;;  %v1889_v20 = vpop.permute.xlu1 %934 }
 0x10e   : > { %2223 = vst [vmem:[#allocation8_spill] sm:$0xff] %v1889_v20 }
 0x110   : > { %999 = vperm.xlu0 %1308, %v1529_v13   ;;  %922 = vrot.lane.b32.xlu1 %v1729_v14, %s1390_s17 }
 0x111   : > { %v1896_v13 = vpop.permute.xlu1 %938 }
 0x112   : > { %2224 = vst [vmem:[#allocation9_spill] sm:$0xff] %v1896_v13 }
 0x114   : > { %971 = vrot.lane.b32.xlu0 %v1663_v44, %s1391_s18  ;;  %804 = vrot.lane.b32.xlu1 %v1799_v1, %s1388_s12 }
 0x115   : > { %1309 = vset.pattern.permute.xlu0 %v1376_v3  ;;  %v1902_v3 = vand.u32 127, %v327_v21  ;;  %v1913_v21 = vpop.permute.xlu0 %771 }
 0x117   : > { %vm528_vm0 = vcmp.lt.s32.totalorder %v1902_v3, 17  ;;  %vm603_vm1 = vcmp.lt.s32.totalorder %v1902_v3, 16  ;;  %vm660_vm2 = vcmp.lt.s32.totalorder %v1902_v3, 15  ;;  %vm717_vm3 = vcmp.lt.s32.totalorder %v1902_v3, 1 }
 0x118   : > { %977 = vrot.lane.b32.xlu0 %v1677_v54, %s1391_s18  ;;  %810 = vrot.lane.b32.xlu1 %v1783_v8, %s1388_s12  ;;  %vm812_vm4 = vcmp.lt.s32.totalorder %v1902_v3, 127  ;;  %vm869_vm5 = vcmp.lt.s32.totalorder %v1902_v3, 113  ;;  %vm926_vm6 = vcmp.lt.s32.totalorder %v1902_v3, 112  ;;  %vm983_vm7 = vcmp.lt.s32.totalorder %v1902_v3, 111  ;;  %s1205_s12 = sshll.u32 %s296_s10, 3 }
 0x11c   : > { %861 = vrot.lane.b32.xlu0 %v1799_v1, %s1389_s13  ;;  %973 = vrot.lane.b32.xlu1 %v1706_v55, %s1391_s18 }
 0x120   : > { %918 = vrot.lane.b32.xlu0 %v1799_v1, %s1390_s17  ;;  %979 = vrot.lane.b32.xlu1 %v1729_v14, %s1391_s18 }
 0x124   : > { %975 = vrot.lane.b32.xlu0 %v1799_v1, %s1391_s18  ;;  %867 = vrot.lane.b32.xlu1 %v1783_v8, %s1389_s13  ;;  %s1217_s13 = sshll.u32 %s1460_s9, 7  ;;  %s1393_s9 = smov [#allocation2]  }
 0x125   : > { %s2160_s21 = scalar_lea.hbm %s2210_s8, %s1217_s13  ;;  %s1315_s24 = sshll.u32 %s1393_s9, 4  ;;  %s1316_s24 = int_to_ptr.vmem [resolvable:$false] %s1315_s24 }
 0x126   : > { %s1317_s25 = scalar_lea.vmem %s1316_s24, 256 }
 0x127   : > { %v515_v60 = vpop.permute.xlu1 %514 }
 0x128   : > { %924 = vrot.lane.b32.xlu1 %v1783_v8, %s1390_s17  ;;  %1038 = vperm.xlu0 %1309, %v1035_v17   ;;  %s298_s17 = scalar_lea.vmem [#allocation2], %s1205_s12 }
 0x12b   : > { %v521_v10 = vpop.permute.xlu1 %520 }
 0x12c   : > { %v529_v11 = vsel %vm528_vm0, %v515_v60, %v521_v10  ;;  %v532_v24 = vsel %vm528_vm0, %v521_v10, %v515_v60  ;;  %981 = vrot.lane.b32.xlu1 %v1783_v8, %s1391_s18  ;;  %s1142_s18 = sshll.u32 %s298_s17, 4  ;;  %s2162_s18 = int_to_ptr.vmem [resolvable:$true] %s1142_s18 }
 0x12d   : > { %v564_v36 = vmul.f32 %v1715_v43, %v532_v24  ;;  %v565_v58 = vmul.f32 %v1718_v5, %v529_v11  ;;  %s1311_s23 = scalar_lea.vmem %s2162_s18, 128  ;;  %p1318_p0 = scmp.lt.s32.totalorder %s2162_s18, %s1316_s24 }
 0x12e   : > { %p1312_p11 = scmp.ne.s32.totalorder %s2162_s18, %s1311_s23  ;;  %p1319_p1 = scmp.lt.s32.totalorder %s1317_s25, %s1311_s23 }
 0x130   : > { %p1313_p12 = pnand %p1312_p11, %p1477_p5  ;;  %p1320_p2 = por %p1319_p1, %p1318_p0 }
 0x132   : > { %p1314_p13 = pneg %p1313_p12 }
 0x134   : > { %p1321_p3 = pnand %p1320_p2, %p1314_p13 }
 0x136   : > { %v517_v30 = vpop.permute.xlu0 %516  ;;  %v594_v39 = vpop.permute.xlu1 %593 }
 0x13a   : > { %v523_v12 = vpop.permute.xlu0 %522  ;;  %v600_v60 = vpop.permute.xlu1 %599 }
 0x13b   : > { %v530_v43 = vsel %vm528_vm0, %v517_v30, %v523_v12  ;;  %v533_v5 = vsel %vm528_vm0, %v523_v12, %v517_v30  ;;  %v605_v10 = vsel %vm603_vm1, %v594_v39, %v600_v60  ;;  %v608_v11 = vsel %vm603_vm1, %v600_v60, %v594_v39 }
 0x13c   : > { %v566_v24 = vmul.f32 %v1617_v49, %v533_v5  ;;  %v567_v25 = vmul.f32 %v1620_v50, %v530_v43  ;;  %v638_v17 = vmul.f32 %v1770_v56, %v608_v11  ;;  %v639_v29 = vmul.f32 %v1772_v7, %v605_v10 }
 0x13d   : > { %v585_v39 = vadd.f32 %v1635_v59, %v564_v36  ;;  %v586_v49 = vadd.f32 %v1635_v59, %v565_v58 }
 0x13e   : > { %v587_v13 = vadd.f32 %v1780_v46, %v566_v24  ;;  %v588_v20 = vadd.f32 %v1780_v46, %v567_v25  ;;  %v592_v48 = vpop.permute.xlu0 %591  ;;  %v651_v30 = vpop.permute.xlu1 %650 }
 0x140   : > { %v644_v12 = vadd.f32 %v638_v17, %v587_v13  ;;  %v645_v9 = vadd.f32 %v639_v29, %v588_v20 }
 0x142   : > { %v598_v60 = vpop.permute.xlu0 %597  ;;  %v657_v50 = vpop.permute.xlu1 %656 }
 0x143   : > { %v604_v56 = vsel %vm603_vm1, %v592_v48, %v598_v60  ;;  %v607_v7 = vsel %vm603_vm1, %v598_v60, %v592_v48  ;;  %v662_v46 = vsel %vm660_vm2, %v651_v30, %v657_v50  ;;  %v665_v29 = vsel %vm660_vm2, %v657_v50, %v651_v30 }
 0x144   : > { %v636_v20 = vmul.f32 %v1753_v22, %v607_v7  ;;  %v637_v13 = vmul.f32 %v1755_v41, %v604_v56  ;;  %v695_v59 = vmul.f32 %v1790_v0, %v665_v29  ;;  %v696_v36 = vmul.f32 %v1793_v47, %v662_v46 }
 0x145   : > { %v790_v46 = vmul.f32 %v1832_v28, %v1706_v55  ;;  %v791_v29 = vmul.f32 %v1835_v26, %v1729_v14  ;;  %v788_v55 = vmul.f32 %v1760_v37, %v1663_v44  ;;  %v789_v14 = vmul.f32 %v1763_v63, %v1677_v54 }
 0x146   : > { %v642_v58 = vadd.f32 %v636_v20, %v585_v39  ;;  %v643_v43 = vadd.f32 %v637_v13, %v586_v49  ;;  %v701_v5 = vadd.f32 %v695_v59, %v644_v12  ;;  %v702_v10 = vadd.f32 %v696_v36, %v645_v9  ;;  %v649_v11 = vpop.permute.xlu0 %648  ;;  %v525_v48 = vpop.permute.xlu1 %524 }
 0x14a   : > { %v655_v24 = vpop.permute.xlu0 %654  ;;  %v708_v25 = vpop.permute.xlu1 %707 }
 0x14b   : > { %v661_v17 = vsel %vm660_vm2, %v649_v11, %v655_v24  ;;  %v664_v22 = vsel %vm660_vm2, %v655_v24, %v649_v11 }
 0x14c   : > { %v693_v41 = vmul.f32 %v1669_v52, %v664_v22  ;;  %v694_v0 = vmul.f32 %v1672_v53, %v661_v17 }
 0x14e   : > { %v699_v47 = vadd.f32 %v693_v41, %v642_v58  ;;  %v700_v30 = vadd.f32 %v694_v0, %v643_v43  ;;  %v519_v12 = vpop.permute.xlu0 %518  ;;  %v714_v9 = vpop.permute.xlu1 %713 }
 0x14f   : > { %v531_v39 = vsel %vm528_vm0, %v519_v12, %v525_v48  ;;  %v534_v49 = vsel %vm528_vm0, %v525_v48, %v519_v12  ;;  %v719_v60 = vsel %vm717_vm3, %v708_v25, %v714_v9  ;;  %v722_v52 = vsel %vm717_vm3, %v714_v9, %v708_v25 }
 0x150   : > { %v568_v53 = vmul.f32 %v1802_v27, %v534_v49  ;;  %v569_v50 = vmul.f32 %v1805_v51, %v531_v39  ;;  %v752_v56 = vmul.f32 %v1815_v34, %v722_v52  ;;  %v753_v7 = vmul.f32 %v1818_v38, %v719_v60 }
 0x152   : > { %v758_v20 = vadd.f32 %v752_v56, %v701_v5  ;;  %v759_v13 = vadd.f32 %v753_v7, %v702_v10  ;;  %v706_v59 = vpop.permute.xlu0 %705  ;;  %v590_v44 = vadd.f32 %v1856_v6, %v569_v50 }
 0x154   : > { %v796_v36 = vadd.f32 %v790_v46, %v758_v20  ;;  %v797_v58 = vadd.f32 %v791_v29, %v759_v13 }
 0x156   : > { %v712_v43 = vpop.permute.xlu0 %711 }
 0x157   : > { %v718_v27 = vsel %vm717_vm3, %v706_v59, %v712_v43  ;;  %v721_v51 = vsel %vm717_vm3, %v712_v43, %v706_v59 }
 0x158   : > { %v750_v34 = vmul.f32 %v1709_v62, %v721_v51  ;;  %v751_v38 = vmul.f32 %v1712_v35, %v718_v27  ;;  %v589_v35 = vadd.f32 %v1856_v6, %v568_v53 }
 0x15a   : > { %v756_v28 = vadd.f32 %v750_v34, %v699_v47  ;;  %v757_v26 = vadd.f32 %v751_v38, %v700_v30  ;;  %v596_v48 = vpop.permute.xlu0 %595  ;;  %v1997_v47 = vrot.slane %v1582_v31, %v1601_v40  ;;  %v2001_v30 = vrot.slane %v1587_v32, %v1601_v40 }
 0x15b   : > { %v786_v38 = vmul.f32 %v1741_v23, %v1913_v21  ;;  %v2040_v23 = vrot.slane %v1582_v31, %v1605_v42 }
 0x15c   : > { %v794_v5 = vadd.f32 %v788_v55, %v756_v28  ;;  %v795_v10 = vadd.f32 %v789_v14, %v757_v26  ;;  %v841_v49 = vmul.f32 %v1997_v47, %v1871_v61  ;;  %v842_v40 = vmul.f32 %v2001_v30, %v1871_v61 }
 0x15d   : > { %v839_v46 = vmul.f32 %v1997_v47, %v1863_v18  ;;  %v840_v29 = vmul.f32 %v2001_v30, %v1863_v18  ;;  %v787_v55 = vmul.f32 %v1745_v33, %v1913_v21  ;;  %v2044_v33 = vrot.slane %v1587_v32, %v1605_v42 }
 0x15e   : > { %v792_v21 = vmul.f32 %v786_v38, %v1799_v1 }
 0x15f   : > { %v1981_v11 = vpop.permute.xlu1 %991  ;;  %v897_v42 = vmul.f32 %v2044_v33, %v1876_v19 }
 0x163   : > { %v602_v24 = vpop.permute.xlu1 %601 }
 0x164   : > { %v606_v25 = vsel %vm603_vm1, %v596_v48, %v602_v24  ;;  %v609_v62 = vsel %vm603_vm1, %v602_v24, %v596_v48 }
 0x165   : > { %v640_v54 = vmul.f32 %v1824_v57, %v609_v62  ;;  %v641_v37 = vmul.f32 %v1826_v45, %v606_v25 }
 0x167   : > { %v646_v63 = vadd.f32 %v640_v54, %v589_v35  ;;  %v647_v17 = vadd.f32 %v641_v37, %v590_v44  ;;  %v1991_v22 = vpop.permute.xlu1 %995  ;;  %v896_v44 = vmul.f32 %v2040_v23, %v1876_v19  ;;  %v2225_v54 = vld [vmem:[#allocation7_spill] sm:$0xff] }
 0x168   : > { %v898_v1 = vmul.f32 %v2040_v23, %v2225_v54 }
 0x16b   : > { %v1993_v41 = vpop.permute.xlu0 %828  ;;  %v659_v0 = vpop.permute.xlu1 %658 }
 0x16f   : > { %v653_v6 = vpop.permute.xlu0 %652  ;;  %v803_v12 = vpop.permute.xlu1 %802 }
 0x170   : > { %v663_v57 = vsel %vm660_vm2, %v653_v6, %v659_v0  ;;  %v666_v45 = vsel %vm660_vm2, %v659_v0, %v653_v6 }
 0x171   : > { %v697_v9 = vmul.f32 %v1683_v2, %v666_v45  ;;  %v698_v39 = vmul.f32 %v1686_v4, %v663_v57 }
 0x173   : > { %v703_v60 = vadd.f32 %v697_v9, %v646_v63  ;;  %v704_v52 = vadd.f32 %v698_v39, %v647_v17  ;;  %v801_v53 = vpop.permute.xlu0 %800  ;;  %v809_v50 = vpop.permute.xlu1 %808  ;;  %v2226_v39 = vld [vmem:[#allocation6_spill] sm:$0xff] }
 0x174   : > { %v814_v56 = vsel %vm812_vm4, %v803_v12, %v809_v50  ;;  %v817_v2 = vsel %vm812_vm4, %v809_v50, %v803_v12 }
 0x175   : > { %v847_v7 = vmul.f32 %v841_v49, %v814_v56  ;;  %v848_v4 = vmul.f32 %v842_v40, %v817_v2  ;;  %v2071_v49 = vrot.slane %v1582_v31, %v2226_v39  ;;  %v2075_v40 = vrot.slane %v1587_v32, %v2226_v39 }
 0x177   : > { %v853_v20 = vadd.f32 %v847_v7, %v796_v36  ;;  %v854_v61 = vadd.f32 %v848_v4, %v797_v58  ;;  %v807_v13 = vpop.permute.xlu0 %806  ;;  %v710_v59 = vpop.permute.xlu1 %709  ;;  %v2227_v7 = vld [vmem:[#allocation8_spill] sm:$0xff] }
 0x178   : > { %v813_v43 = vsel %vm812_vm4, %v801_v53, %v807_v13  ;;  %v816_v27 = vsel %vm812_vm4, %v807_v13, %v801_v53  ;;  %v953_v4 = vmul.f32 %v2071_v49, %v2227_v7  ;;  %v954_v31 = vmul.f32 %v2075_v40, %v2227_v7 }
 0x179   : > { %v845_v51 = vmul.f32 %v839_v46, %v813_v43  ;;  %v846_v34 = vmul.f32 %v840_v29, %v816_v27 }
 0x17b   : > { %v851_v14 = vadd.f32 %v845_v51, %v794_v5  ;;  %v852_v18 = vadd.f32 %v846_v34, %v795_v10  ;;  %v2030_v36 = vpop.permute.xlu0 %885  ;;  %v716_v58 = vpop.permute.xlu1 %715  ;;  %v793_v5 = vmul.f32 %v787_v55, %v1783_v8  ;;  %v899_v8 = vmul.f32 %v2044_v33, %v2225_v54 }
 0x17c   : > { %v720_v28 = vsel %vm717_vm3, %v710_v59, %v716_v58  ;;  %v723_v26 = vsel %vm717_vm3, %v716_v58, %v710_v59  ;;  %v2228_v59 = vld [vmem:[#allocation9_spill] sm:$0xff] }
 0x17d   : > { %v754_v48 = vmul.f32 %v1732_v15, %v723_v26  ;;  %v755_v24 = vmul.f32 %v1735_v16, %v720_v28  ;;  %v955_v43 = vmul.f32 %v2071_v49, %v2228_v59  ;;  %v956_v27 = vmul.f32 %v2075_v40, %v2228_v59 }
 0x17f   : > { %v760_v10 = vadd.f32 %v754_v48, %v703_v60  ;;  %v761_v25 = vadd.f32 %v755_v24, %v704_v52  ;;  %v858_v62 = vpop.permute.xlu0 %857  ;;  %v860_v35 = vpop.permute.xlu1 %859 }
 0x181   : > { %v2049_v15 = vadd.f32 %v792_v21, %v760_v10  ;;  %v2051_v16 = vadd.f32 %v793_v5, %v761_v25  ;;  %v1208_v5 = vld [vmem:[%s2207_s5 + $0x10] ss:$0 sm:$0xff] }
 0x182   : > { %v1010_v10 = vmul.f32 %v1208_v5, %v1981_v11 }
 0x183   : > { %v864_v37 = vpop.permute.xlu0 %863  ;;  %v866_v63 = vpop.permute.xlu1 %865 }
 0x184   : > { %v870_v17 = vsel %vm869_vm5, %v858_v62, %v864_v37  ;;  %v873_v0 = vsel %vm869_vm5, %v864_v37, %v858_v62  ;;  %v871_v6 = vsel %vm869_vm5, %v860_v35, %v866_v63  ;;  %v874_v19 = vsel %vm869_vm5, %v866_v63, %v860_v35  ;;  %v1209_v35 = vld [vmem:[%s2207_s5 + $0x18] ss:$0 sm:$0xff] }
 0x185   : > { %v902_v12 = vmul.f32 %v896_v44, %v870_v17  ;;  %v903_v57 = vmul.f32 %v897_v42, %v873_v0  ;;  %v904_v45 = vmul.f32 %v898_v1, %v871_v6  ;;  %v905_v9 = vmul.f32 %v899_v8, %v874_v19 }
 0x186   : > { %v1011_v1 = vmul.f32 %v1209_v35, %v1981_v11  ;;  %v1012_v17 = vmul.f32 %v1208_v5, %v1991_v22  ;;  %v1013_v0 = vmul.f32 %v1209_v35, %v1991_v22  ;;  %v843_v22 = vmul.f32 %v1997_v47, %v1993_v41 }
 0x187   : > { %v908_v60 = vadd.f32 %v902_v12, %v851_v14  ;;  %v909_v52 = vadd.f32 %v903_v57, %v852_v18  ;;  %v910_v53 = vadd.f32 %v904_v45, %v853_v20  ;;  %v911_v50 = vadd.f32 %v905_v9, %v854_v61  ;;  %v2077_v56 = vpop.permute.xlu0 %942  ;;  %v915_v2 = vpop.permute.xlu1 %914 }
 0x18b   : > { %v921_v46 = vpop.permute.xlu0 %920  ;;  %v917_v29 = vpop.permute.xlu1 %916 }
 0x18c   : > { %v927_v32 = vsel %vm926_vm6, %v915_v2, %v921_v46  ;;  %v930_v20 = vsel %vm926_vm6, %v921_v46, %v915_v2 }
 0x18d   : > { %v959_v61 = vmul.f32 %v953_v4, %v927_v32  ;;  %v960_v13 = vmul.f32 %v954_v31, %v930_v20 }
 0x18f   : > { %v965_v51 = vadd.f32 %v959_v61, %v908_v60  ;;  %v2092_v34 = vpop.permute.xlu0 %999  ;;  %v923_v38 = vpop.permute.xlu1 %922  ;;  %v966_v55 = vadd.f32 %v960_v13, %v909_v52  ;;  %v844_v52 = vmul.f32 %v2001_v30, %v1993_v41 }
 0x190   : > { %v928_v14 = vsel %vm926_vm6, %v917_v29, %v923_v38  ;;  %v931_v18 = vsel %vm926_vm6, %v923_v38, %v917_v29 }
 0x191   : > { %v961_v58 = vmul.f32 %v955_v43, %v928_v14  ;;  %v962_v28 = vmul.f32 %v956_v27, %v931_v18 }
 0x193   : > { %v967_v26 = vadd.f32 %v961_v58, %v910_v53  ;;  %v972_v48 = vpop.permute.xlu0 %971  ;;  %v805_v24 = vpop.permute.xlu1 %804  ;;  %v968_v21 = vadd.f32 %v962_v28, %v911_v50  ;;  %v900_v53 = vmul.f32 %v2040_v23, %v2030_v36  ;;  %v901_v50 = vmul.f32 %v2044_v33, %v2030_v36 }
 0x194   : > { %v957_v23 = vmul.f32 %v2071_v49, %v2077_v56  ;;  %v958_v36 = vmul.f32 %v2075_v40, %v2077_v56  ;;  %v1014_v40 = vmul.f32 %v1208_v5, %v2092_v34  ;;  %v1015_v56 = vmul.f32 %v1209_v35, %v2092_v34  ;;  %v1034_v34 = vld [vmem:[%s2208_s6] sm:$0xf] }
 0x197   : > { %v978_v25 = vpop.permute.xlu0 %977  ;;  %v811_v62 = vpop.permute.xlu1 %810 }
 0x198   : > { %v984_v44 = vsel %vm983_vm7, %v972_v48, %v978_v25  ;;  %v987_v54 = vsel %vm983_vm7, %v978_v25, %v972_v48  ;;  %v815_v12 = vsel %vm812_vm4, %v805_v24, %v811_v62  ;;  %v818_v11 = vsel %vm812_vm4, %v811_v62, %v805_v24 }
 0x199   : > { %v1016_v42 = vmul.f32 %v1010_v10, %v984_v44  ;;  %v1017_v63 = vmul.f32 %v1011_v1, %v987_v54  ;;  %v849_v31 = vmul.f32 %v843_v22, %v815_v12  ;;  %v850_v46 = vmul.f32 %v844_v52, %v818_v11 }
 0x19b   : > { %v974_v8 = vpop.permute.xlu1 %973  ;;  %v1022_v37 = vadd.f32 %v1016_v42, %v965_v51  ;;  %v862_v6 = vpop.permute.xlu0 %861  ;;  %v1023_v60 = vadd.f32 %v1017_v63, %v966_v55  ;;  %v855_v55 = vadd.f32 %v849_v31, %v2049_v15  ;;  %v856_v14 = vadd.f32 %v850_v46, %v2051_v16 }
 0x19d   : > { %v1029_v20 = vmax.f32 %v1023_v60, 0.0  ;;  %v1028_v30 = vmax.f32 %v1022_v37, 0.0  ;;  %v2229_v37 = vld [vmem:[#allocation5_spill] sm:$0xff] }
 0x19e   : > { %v1118_v63 = vcombine.high %v2229_v37, %v2229_v37 }
 0x19f   : > { %v980_v19 = vpop.permute.xlu1 %979  ;;  %v919_v32 = vpop.permute.xlu0 %918 }
 0x1a0   : > { %v985_v57 = vsel %vm983_vm7, %v974_v8, %v980_v19  ;;  %v988_v45 = vsel %vm983_vm7, %v980_v19, %v974_v8 }
 0x1a1   : > { %v1018_v9 = vmul.f32 %v1012_v17, %v985_v57  ;;  %v1019_v39 = vmul.f32 %v1013_v0, %v988_v45 }
 0x1a3   : > { %v868_v2 = vpop.permute.xlu1 %867  ;;  %v1025_v7 = vadd.f32 %v1019_v39, %v968_v21  ;;  %v1024_v4 = vadd.f32 %v1018_v9, %v967_v26  ;;  %v976_v58 = vpop.permute.xlu0 %975 }
 0x1a4   : > { %v872_v29 = vsel %vm869_vm5, %v862_v6, %v868_v2  ;;  %v875_v47 = vsel %vm869_vm5, %v868_v2, %v862_v6 }
 0x1a5   : > { %v1031_v41 = vmax.f32 %v1025_v7, 0.0  ;;  %v1030_v61 = vmax.f32 %v1024_v4, 0.0  ;;  %v906_v33 = vmul.f32 %v900_v53, %v872_v29  ;;  %v907_v13 = vmul.f32 %v901_v50, %v875_v47 }
 0x1a7   : > { %v925_v59 = vpop.permute.xlu1 %924  ;;  %v1218_v43 = vpack.c.bf16 %v1031_v41, %v1029_v20  ;;  %v1220_v27 = vpack.c.bf16 %v1030_v61, %v1028_v30  ;;  %v912_v28 = vadd.f32 %v906_v33, %v855_v55  ;;  %v913_v26 = vadd.f32 %v907_v13, %v856_v14  ;;  %v1039_v3 = vpop.permute.xlu0 %1038 }
 0x1a8   : > { %v929_v51 = vsel %vm926_vm6, %v919_v32, %v925_v59  ;;  %v932_v38 = vsel %vm926_vm6, %v925_v59, %v919_v32 }
 0x1a9   : > { %v963_v18 = vmul.f32 %v957_v23, %v929_v51  ;;  %v964_v49 = vmul.f32 %v958_v36, %v932_v38  ;;  %1219 = vmatprep.subr.bf16.mxu0 %v1218_v43 }
 0x1aa   : > { %1221 = vmatpush1.bf16.msra.mxu0 %v1220_v27 }
 0x1ab   : > { %v982_v48 = vpop.permute.xlu1 %981  ;;  %v969_v16 = vadd.f32 %v963_v18, %v912_v28  ;;  %v970_v21 = vadd.f32 %v964_v49, %v913_v26 }
 0x1ac   : > { %v986_v24 = vsel %vm983_vm7, %v976_v58, %v982_v48  ;;  %v989_v15 = vsel %vm983_vm7, %v982_v48, %v976_v58 }
 0x1ad   : > { %v1020_v10 = vmul.f32 %v1014_v40, %v986_v24  ;;  %v1021_v25 = vmul.f32 %v1015_v56, %v989_v15 }
 0x1af   : > { %v1027_v62 = vadd.f32 %v1021_v25, %v970_v21  ;;  %v1026_v44 = vadd.f32 %v1020_v10, %v969_v16 }
 0x1b1   : > { %v1033_v5 = vmax.f32 %v1027_v62, 0.0  ;;  %v1032_v42 = vmax.f32 %v1026_v44, 0.0 }
 0x1b3   : > { %1049 = vmatprep.subr.mxu0 %v1033_v5 }
 0x1b4   : > { %1050 = vmatpush1.msra.mxu0 %v1032_v42 }
 0x1b5   : > { %1210 = vmatmul.mubr.msk.f32.vlgmr.msra.gmra.mrb[0].mxu0 %vm1041_vm8, %v1034_v34 }
 0x288   : > { %v1111_v35 = vpop.f32.mrb[0].mxu0 }
 0x289   : > { %v1112_v54 = vadd.f32 %v1111_v35, %v1039_v3  ;;  %v1113_v1 = vpop.f32.mrb[1].mxu0 }
 0x28a   : > { %v1114_v8 = vadd.f32 %v1113_v1, %v1039_v3 }
 0x28b   : > { %v1116_v17 = vmax.f32 %v1112_v54, 0.0 }
 0x28c   : > { %v1117_v0 = vmax.f32 %v1114_v8, 0.0 }
 0x28d   : > { %v1120_v6 = vadd.f32 %v1116_v17, %v2229_v37 }
 0x28e   : > { %v1121_v19 = vadd.f32 %v1118_v63, %v1117_v0 }
 0x290   : > { %v1124_v12 = vcombine.low %v1120_v6, %v1121_v19 }
 0x292   : > { %1126 = vst [vmem:[%s298_s17] sm:$0xff] %v1124_v12 }
 0x293   : > { %1324 = shalt.err (!%p1321_p3)
}
 0x294   : > { %s1325_s26 = scalar_lea.hbm %s2160_s21, 128  ;;  %s1329_s13 = scalar_lea.hbm %s2210_s8, 256 }
 0x295   : > { %p1326_p4 = scmp.ne.s32.totalorder %s2160_s21, %s1325_s26  ;;  %p1330_p9 = scmp.lt.u32.totalorder %s2160_s21, %s2210_s8 }
 0x296   : > { %p1331_p10 = scmp.lt.u32.totalorder %s1329_s13, %s1325_s26  ;;  %p1333_p12 = scmp.lt.u32.totalorder %s1325_s26, %s2160_s21 }
 0x297   : > { %p1327_p7 = pnand %p1326_p4, %p1477_p5 }
 0x298   : > { %p1332_p11 = por %p1331_p10, %p1330_p9 }
 0x299   : > { %p1328_p8 = pneg %p1327_p7 }
 0x29a   : > { %p1334_p13 = por %p1333_p12, %p1332_p11 }
 0x29c   : > { %p1335_p0 = pnand %p1334_p13, %p1328_p8 }
 0x29e   : > { %1338 = shalt.err (!%p1335_p0)
}
 0x29f   : > { %1222 = dma.vmem_to_hbm [thread:$0]  (%p1477_p5), %s2162_s18, 128, %s2160_s21, %s1128_s22  }
 0x2a0 PF: > { %p1228_p1 = scmp.ge.s32.totalorder %s1373_s30, 2  ;;  %s1154_s20 = sand.u32 1, %s1361_s27  }
 0x2a1   : > { %s1155_s23 = scalar_lea.sflag [#allocation3], %s1154_s20 }
 0x2a2   : > { %p1225_p2 = pnand %p1228_p1, %p1481_p6 }
 0x2a4   : > { %1356 = dma.done.wait (!%p1225_p2), %s1155_s23, 128  }
 0x2a5   : > { %1358 = vsyncadd (!%p1225_p2), %s1155_s23, 4294967168  ;;  %p18_p3 = scmp.ge.s32.totalorder %s1464_s11, 4   ;;  %s2230_s27 = smov %s1365_s28 }
 0x2a6   : > { %s2231_s28 = smov %s1369_s29  ;;  %s2232_s29 = smov %s1475_s14 }
 0x2a7   : > { %s2233_s30 = smov %s1464_s11  ;;  %20 = sbr.rel (!%p18_p3) target bundleno = 3 (0x3), region = 87 }
 0x2ae   :  { %1160 = vsyncpa [#allocation3], 1 }
 0x2af   :  { %1162 = vsyncpa [#allocation3 + $0x1], 1 }

</bundles_post_ra>
